<compile_context>
chip_gen: v7x
topology: tpu7x:2x2x1
jax: 0.10.0
libtpu: 0.0.40
codegen_flags: <defaults>
</compile_context>

<pallas_src>
import functools

import jax
import jax.numpy as jnp
from jax import lax
from jax.experimental import pallas as pl
from jax.experimental.pallas import tpu as pltpu

# ----- hyperparameters (module __init__ args), deterministic, in-script -----
ALPHA = 0.25
GAMMA = 2.0
POS = 0.9
NEG = 0.1

_LANES = 1024        # wide, lane-dense slab (multiple of 128)
_MAX_TILE_ROWS = 512  # (512, 1024) f32 tile = 2 MiB -> fits all generations
_SUBLANES = 8


def _softplus(x):
    # numerically stable softplus: max(x, 0) + log1p(exp(-|x|))
    return jnp.maximum(x, 0.0) + jnp.log1p(jnp.exp(-jnp.abs(x)))


def _focal_loss_kernel(logits_ref, target_ref, out_ref, *, alpha, gamma, pos, neg):
    x = logits_ref[...].astype(jnp.float32)
    t = target_ref[...].astype(jnp.float32)

    # One softplus covers both log-sigmoids; sigmoid reuses log_sigmoid.
    sp = _softplus(x)                 # softplus(x)          (1 exp + 1 log1p)
    log_sigmoid = x - sp              # log(sigmoid(x))
    log_sigmoid_inv = -sp             # log(sigmoid(-x))
    sigmoid_pred = jnp.exp(log_sigmoid)   # sigmoid(x)       (1 exp)

    is_pos = (t == 1.0).astype(jnp.float32)
    is_neg = (t == 0.0).astype(jnp.float32)

    d_pos = jnp.abs(pos - sigmoid_pred)
    d_neg = jnp.abs(sigmoid_pred - neg)
    g = float(gamma)
    if g == 2.0:
        pow_pos = d_pos * d_pos
        pow_neg = d_neg * d_neg
    elif g == int(g):
        pow_pos = lax.integer_pow(d_pos, int(g))
        pow_neg = lax.integer_pow(d_neg, int(g))
    else:
        pow_pos = jnp.power(d_pos, g)
        pow_neg = jnp.power(d_neg, g)

    coef_pos = is_pos * alpha * pow_pos
    loss = coef_pos * (pos * log_sigmoid + (1.0 - pos) * log_sigmoid_inv)

    coef_neg = is_neg * (1.0 - alpha) * pow_neg
    loss = loss + coef_neg * (neg * log_sigmoid + (1.0 - neg) * log_sigmoid_inv)

    out_ref[...] = (-loss).astype(out_ref.dtype)


def focal_smooth_bce_with_logits_neg_loss(logits, target,
                                          alpha=ALPHA, gamma=GAMMA,
                                          pos=POS, neg=NEG):
    """Elementwise loss, same shape as logits (no reduction, like the module)."""
    orig_shape = logits.shape
    out_dtype = logits.dtype
    n = logits.size

    # Lane-dense slab: (rows_padded, 1024), tiled (tile_rows, 1024).
    rows = -(-n // _LANES)                                    # ceil
    tile_rows = min(_MAX_TILE_ROWS, -(-rows // _SUBLANES) * _SUBLANES)
    rows_padded = -(-rows // tile_rows) * tile_rows
    total = rows_padded * _LANES

    # Native-dtype, zero-copy reshape when possible; a single pad otherwise.
    # Padded tail is sliced off after the kernel, so its value is irrelevant.
    logits_flat = logits.reshape(-1)
    target_flat = target.reshape(-1)
    if total != n:
        logits_flat = jnp.pad(logits_flat, (0, total - n))
        target_flat = jnp.pad(target_flat, (0, total - n))
    logits_2d = logits_flat.reshape(rows_padded, _LANES)
    target_2d = target_flat.reshape(rows_padded, _LANES)

    grid = (rows_padded // tile_rows,)

    kernel = functools.partial(_focal_loss_kernel,
                               alpha=alpha, gamma=gamma, pos=pos, neg=neg)

    out_2d = pl.pallas_call(
        kernel,
        out_shape=jax.ShapeDtypeStruct((rows_padded, _LANES), out_dtype),
        grid_spec=pltpu.PrefetchScalarGridSpec(
            num_scalar_prefetch=0,
            grid=grid,
            in_specs=[
                pl.BlockSpec((tile_rows, _LANES), lambda i: (i, 0)),
                pl.BlockSpec((tile_rows, _LANES), lambda i: (i, 0)),
            ],
            out_specs=pl.BlockSpec((tile_rows, _LANES), lambda i: (i, 0)),
        ),
        compiler_params=pltpu.CompilerParams(
            dimension_semantics=("parallel",)),
    )(logits_2d, target_2d)

    out = out_2d.reshape(-1)
    if total != n:
        out = out[:n]
    return out.reshape(orig_shape)


def _reference(logits, target, alpha=ALPHA, gamma=GAMMA, pos=POS, neg=NEG):
    x = logits.astype(jnp.float32)
    t = target.astype(jnp.float32)
    sigmoid_pred = jax.nn.sigmoid(x)
    log_sigmoid = jax.nn.log_sigmoid(x)
    log_sigmoid_inv = jax.nn.log_sigmoid(-x)
    coef = (t == 1.0) * alpha * jnp.power(jnp.abs(pos - sigmoid_pred), gamma)
    loss = coef * (pos * log_sigmoid + (1.0 - pos) * log_sigmoid_inv)
    coef = (t == 0.0) * (1.0 - alpha) * jnp.power(jnp.abs(sigmoid_pred - neg), gamma)
    loss = loss + coef * (neg * log_sigmoid + (1.0 - neg) * log_sigmoid_inv)
    return -loss


if __name__ == "__main__":
    key = jax.random.PRNGKey(0)
    k1, k2 = jax.random.split(key)

    # NCHW-shaped inputs, as a conv-head multi-label segmentation loss would see.
    shape = (2, 4, 16, 16)
    logits = jax.random.normal(k1, shape, dtype=jnp.float32) * 2.0
    target = jax.random.bernoulli(k2, 0.3, shape).astype(jnp.float32)

    out = focal_smooth_bce_with_logits_neg_loss(logits, target)
    out = jax.block_until_ready(out)

    ref = _reference(logits, target)
    assert out.shape == shape
    assert jnp.allclose(out, ref, atol=1e-5, rtol=1e-5), (
        float(jnp.max(jnp.abs(out - ref))))

    print("KERNEL_OK")
</pallas_src>

<mosaic_0001>
module attributes {stable_mosaic.version = 11 : i64} {
  func.func @_focal_loss_kernel(%arg0: i32, %arg1: memref<8x1024xf32, #tpu.memory_space<vmem>>, %arg2: memref<8x1024xf32, #tpu.memory_space<vmem>>, %arg3: memref<8x1024xf32, #tpu.memory_space<vmem>>) attributes {dimension_semantics = [#tpu.dimension_semantics<parallel>], iteration_bounds = array<i64: 1>, scalar_prefetch = 0 : i64, scratch_operands = 0 : i64, tpu.core_type = #tpu.core_type<tc>, window_params = [{transform_indices = @transform_0, window_bounds = array<i64: 8, 1024>}, {transform_indices = @transform_1, window_bounds = array<i64: 8, 1024>}, {transform_indices = @transform_2, window_bounds = array<i64: 8, 1024>}]} {
    %c0 = arith.constant 0 : index
    %c0_0 = arith.constant 0 : index
    %0 = vector.load %arg1[%c0, %c0_0] : memref<8x1024xf32, #tpu.memory_space<vmem>>, vector<8x1024xf32>
    %c0_1 = arith.constant 0 : index
    %c0_2 = arith.constant 0 : index
    %1 = vector.load %arg2[%c0_1, %c0_2] : memref<8x1024xf32, #tpu.memory_space<vmem>>, vector<8x1024xf32>
    %cst = arith.constant 0.000000e+00 : f32
    %2 = vector.broadcast %cst : f32 to vector<8x1024xf32>
    %3 = arith.maximumf %0, %2 : vector<8x1024xf32>
    %4 = math.absf %0 : vector<8x1024xf32>
    %cst_3 = arith.constant 0.000000e+00 : f32
    %5 = vector.broadcast %cst_3 : f32 to vector<8x1024xf32>
    %6 = arith.subf %5, %4 : vector<8x1024xf32>
    %7 = math.exp %6 : vector<8x1024xf32>
    %8 = math.log1p %7 : vector<8x1024xf32>
    %9 = arith.addf %3, %8 : vector<8x1024xf32>
    %10 = arith.subf %0, %9 : vector<8x1024xf32>
    %cst_4 = arith.constant 0.000000e+00 : f32
    %11 = vector.broadcast %cst_4 : f32 to vector<8x1024xf32>
    %12 = arith.subf %11, %9 : vector<8x1024xf32>
    %13 = math.exp %10 : vector<8x1024xf32>
    %cst_5 = arith.constant 1.000000e+00 : f32
    %14 = vector.broadcast %cst_5 : f32 to vector<8x1024xf32>
    %15 = arith.cmpf oeq, %1, %14 : vector<8x1024xf32>
    %16 = arith.extui %15 : vector<8x1024xi1> to vector<8x1024xi32>
    %17 = arith.sitofp %16 : vector<8x1024xi32> to vector<8x1024xf32>
    %cst_6 = arith.constant 0.000000e+00 : f32
    %18 = vector.broadcast %cst_6 : f32 to vector<8x1024xf32>
    %19 = arith.cmpf oeq, %1, %18 : vector<8x1024xf32>
    %20 = arith.extui %19 : vector<8x1024xi1> to vector<8x1024xi32>
    %21 = arith.sitofp %20 : vector<8x1024xi32> to vector<8x1024xf32>
    %cst_7 = arith.constant 0.899999976 : f32
    %22 = vector.broadcast %cst_7 : f32 to vector<8x1024xf32>
    %23 = arith.subf %22, %13 : vector<8x1024xf32>
    %24 = math.absf %23 : vector<8x1024xf32>
    %cst_8 = arith.constant 1.000000e-01 : f32
    %25 = vector.broadcast %cst_8 : f32 to vector<8x1024xf32>
    %26 = arith.subf %13, %25 : vector<8x1024xf32>
    %27 = math.absf %26 : vector<8x1024xf32>
    %28 = arith.mulf %24, %24 : vector<8x1024xf32>
    %29 = arith.mulf %27, %27 : vector<8x1024xf32>
    %cst_9 = arith.constant 2.500000e-01 : f32
    %30 = vector.broadcast %cst_9 : f32 to vector<8x1024xf32>
    %31 = arith.mulf %17, %30 : vector<8x1024xf32>
    %32 = arith.mulf %31, %28 : vector<8x1024xf32>
    %cst_10 = arith.constant 0.899999976 : f32
    %33 = vector.broadcast %cst_10 : f32 to vector<8x1024xf32>
    %34 = arith.mulf %33, %10 : vector<8x1024xf32>
    %cst_11 = arith.constant 1.000000e-01 : f32
    %35 = vector.broadcast %cst_11 : f32 to vector<8x1024xf32>
    %36 = arith.mulf %35, %12 : vector<8x1024xf32>
    %37 = arith.addf %34, %36 : vector<8x1024xf32>
    %38 = arith.mulf %32, %37 : vector<8x1024xf32>
    %cst_12 = arith.constant 7.500000e-01 : f32
    %39 = vector.broadcast %cst_12 : f32 to vector<8x1024xf32>
    %40 = arith.mulf %21, %39 : vector<8x1024xf32>
    %41 = arith.mulf %40, %29 : vector<8x1024xf32>
    %cst_13 = arith.constant 1.000000e-01 : f32
    %42 = vector.broadcast %cst_13 : f32 to vector<8x1024xf32>
    %43 = arith.mulf %42, %10 : vector<8x1024xf32>
    %cst_14 = arith.constant 0.899999976 : f32
    %44 = vector.broadcast %cst_14 : f32 to vector<8x1024xf32>
    %45 = arith.mulf %44, %12 : vector<8x1024xf32>
    %46 = arith.addf %43, %45 : vector<8x1024xf32>
    %47 = arith.mulf %41, %46 : vector<8x1024xf32>
    %48 = arith.addf %38, %47 : vector<8x1024xf32>
    %cst_15 = arith.constant 0.000000e+00 : f32
    %49 = vector.broadcast %cst_15 : f32 to vector<8x1024xf32>
    %50 = arith.subf %49, %48 : vector<8x1024xf32>
    %c0_16 = arith.constant 0 : index
    %c0_17 = arith.constant 0 : index
    %51 = vector.load %arg3[%c0_16, %c0_17] : memref<8x1024xf32, #tpu.memory_space<vmem>>, vector<8x1024xf32>
    tpu.vector_store %arg3[%c0_16, %c0_17], %50 {strides = array<i32>} : memref<8x1024xf32, #tpu.memory_space<vmem>>, vector<8x1024xf32>,
    return
  }
  func.func @transform_0(%arg0: i32) -> (i32, i32) {
    %c0_i32 = arith.constant 0 : i32
    %c0_i32_0 = arith.constant 0 : i32
    return %arg0, %c0_i32 : i32, i32
  }
  func.func @transform_1(%arg0: i32) -> (i32, i32) {
    %c0_i32 = arith.constant 0 : i32
    %c0_i32_0 = arith.constant 0 : i32
    return %arg0, %c0_i32 : i32, i32
  }
  func.func @transform_2(%arg0: i32) -> (i32, i32) {
    %c0_i32 = arith.constant 0 : i32
    %c0_i32_0 = arith.constant 0 : i32
    return %arg0, %c0_i32 : i32, i32
  }
}

</mosaic_0001>

<bundles_post_ra>
// kernel: tpu_custom_call.1
= control target key start
LH: loop header
LB: loop body
LE: loop exit
PB: predicated region body
PF: predicated region fallthrough
CT: control target
= control target key end

     0   :  { %7 = vsyncpa [#allocation3], 0  ;;  %s824_s0 = inlined_call_operand.hbm [shape: f32[8,1024], index: 0, kind: input, shape index: {}]   ;;  %s825_s1 = inlined_call_operand.hbm [shape: f32[8,1024], index: 1, kind: input, shape index: {}]   ;;  %s826_s2 = inlined_call_operand.hbm [shape: f32[8,1024], index: 2, kind: output, shape index: {}]  }
   0x1   :  { %8 = vsyncpa [#allocation6], 0 }
   0x2   :  { %9 = vsyncpa [#allocation4], 0  ;;  %s584_s9 = smov [#allocation2]   ;;  %s585_s11 = smov [#allocation5]  }
   0x3   :  { %s16_s10 = sshll.u32 %s584_s9, 4  ;;  %s26_s12 = sshll.u32 %s585_s11, 4  ;;  %s17_s10 = int_to_ptr.vmem [resolvable:$true] %s16_s10  ;;  %s27_s12 = int_to_ptr.vmem [resolvable:$true] %s26_s12 }
   0x4   :  { %s512_s15 = scalar_lea.hbm %s824_s0, 1024 }
   0x5   :  { %p513_p0 = scmp.ne.s32.totalorder %s824_s0, %s512_s15  ;;  %p516_p1 = scmp.lt.u32.totalorder %s512_s15, %s824_s0 }
   0x7   :  { %p518_p2 = pnand %p516_p1, %p513_p0 }
   0x9   :  { %521 = shalt.err (!%p518_p2)
}
   0xa   :  { %s522_s20 = scalar_lea.vmem %s17_s10, 1024  ;;  %p527_p4 = scmp.lt.s32.totalorder %s17_s10, %s17_s10 }
   0xb   :  { %p523_p3 = scmp.ne.s32.totalorder %s17_s10, %s522_s20  ;;  %p528_p5 = scmp.lt.s32.totalorder %s522_s20, %s522_s20 }
   0xd   :  { %p529_p6 = por %p528_p5, %p527_p4 }
   0xf   :  { %p530_p7 = pnand %p529_p6, %p523_p3 }
  0x11   :  { %533 = shalt.err (!%p530_p7)
}
  0x12   :  { %19 = dma.hbm_to_vmem [thread:$0]  %s824_s0, 1024, %s17_s10, [#allocation3]  }
  0x13   :  { %s534_s25 = scalar_lea.hbm %s825_s1, 1024 }
  0x14   :  { %p535_p8 = scmp.ne.s32.totalorder %s825_s1, %s534_s25  ;;  %p538_p9 = scmp.lt.u32.totalorder %s534_s25, %s825_s1 }
  0x16   :  { %p540_p10 = pnand %p538_p9, %p535_p8 }
  0x18   :  { %543 = shalt.err (!%p540_p10)
}
  0x19   :  { %s544_s30 = scalar_lea.vmem %s27_s12, 1024  ;;  %p549_p12 = scmp.lt.s32.totalorder %s27_s12, %s27_s12 }
  0x1a   :  { %p545_p11 = scmp.ne.s32.totalorder %s27_s12, %s544_s30  ;;  %p550_p13 = scmp.lt.s32.totalorder %s544_s30, %s544_s30 }
  0x1c   :  { %p551_p0 = por %p550_p13, %p549_p12 }
  0x1e   :  { %p552_p1 = pnand %p551_p0, %p545_p11 }
  0x20   :  { %555 = shalt.err (!%p552_p1)
}
  0x21   :  { %29 = dma.hbm_to_vmem [thread:$0]  %s825_s1, 1024, %s27_s12, [#allocation6]  }
  0x22   :  { %578 = dma.done.wait [#allocation3], 1024  }
  0x23   :  { %579 = vsyncadd [#allocation3], 4294966272 }
  0x24   :  { %580 = dma.done.wait [#allocation6], 1024  }
  0x25   :  { %581 = vsyncadd [#allocation6], 4294966272  ;;  %v627_v0 = vld [vmem:[#allocation2] sm:$0xff]  ;;  %v629_v1 = vld [vmem:[#allocation2 + $0x8] sm:$0xff]  ;;  %v586_v18 = vmov 0.0   ;;  %s587_s1 = smov [#allocation7]  }
  0x26   :  { %v60_v2 = vand.u32 2147483647, %v627_v0  ;;  %v61_v3 = vand.u32 2147483647, %v629_v1  ;;  %v633_v4 = vld [vmem:[#allocation2 + $0x10] sm:$0xff]  ;;  %v44_v6 = vld [vmem:[#allocation5] sm:$0xff] }
  0x27   :  { %v62_v9 = vand.u32 2147483647, %v633_v4  ;;  %v636_v11 = vld [vmem:[#allocation2 + $0x18] sm:$0xff]  ;;  %vm204_vm0 = vcmp.eq.f32.partialorder %v44_v6, 1.0  ;;  %v45_v12 = vld [vmem:[#allocation5 + $0x8] sm:$0xff]  ;;  %v638_v14 = vld [vmem:[#allocation2 + $0x20] sm:$0xff] }
  0x28   :  { %v68_v5 = vsub.f32 0.0, %v60_v2  ;;  %v69_v7 = vsub.f32 0.0, %v61_v3  ;;  %v46_v15 = vld [vmem:[#allocation5 + $0x10] sm:$0xff]  ;;  %vm228_vm1 = vcmp.eq.f32.partialorder %v44_v6, 0.0  ;;  %v63_v17 = vand.u32 2147483647, %v636_v11 }
  0x29   :  { %v70_v13 = vsub.f32 0.0, %v62_v9  ;;  %v436_v19 = vsel %vm204_vm0, 1.0, %v586_v18  ;;  %vm205_vm2 = vcmp.eq.f32.partialorder %v45_v12, 1.0  ;;  %v64_v20 = vand.u32 2147483647, %v638_v14  ;;  %v643_v21 = vld [vmem:[#allocation2 + $0x28] sm:$0xff] }
  0x2a   :  { %v76_v8 = vmul.f32 1.442695, %v68_v5  ;;  %v78_v10 = vmul.f32 1.442695, %v69_v7  ;;  %vm229_vm3 = vcmp.eq.f32.partialorder %v45_v12, 0.0  ;;  %vm206_vm4 = vcmp.eq.f32.partialorder %v46_v15, 1.0 }
  0x2b   :  { %v80_v16 = vmul.f32 1.442695, %v70_v13  ;;  %v71_v22 = vsub.f32 0.0, %v63_v17  ;;  %v52_v23 = vmax.f32 %v627_v0, 0.0  ;;  %v444_v24 = vsel %vm228_vm1, 1.0, %v586_v18  ;;  %v47_v25 = vld [vmem:[#allocation5 + $0x18] sm:$0xff] }
  0x2c   :  { %464 = vpow2.f32 %v76_v8  ;;  %vm230_vm5 = vcmp.eq.f32.partialorder %v46_v15, 0.0  ;;  %v72_v26 = vsub.f32 0.0, %v64_v20  ;;  %v53_v27 = vmax.f32 %v629_v1, 0.0  ;;  %v654_v35 = vld [vmem:[#allocation2 + $0x30] sm:$0xff]  ;;  %v48_v41 = vld [vmem:[#allocation5 + $0x20] sm:$0xff]  ;;  %v49_v54 = vld [vmem:[#allocation5 + $0x28] sm:$0xff] }
  0x2d   :  { %466 = vpow2.f32 %v78_v10  ;;  %v437_v28 = vsel %vm205_vm2, 1.0, %v586_v18  ;;  %v82_v29 = vmul.f32 1.442695, %v71_v22  ;;  %v65_v30 = vand.u32 2147483647, %v643_v21  ;;  %v685_v15 = vld [vmem:[#allocation2 + $0x38] sm:$0xff] }
  0x2e   :  { %468 = vpow2.f32 %v80_v16  ;;  %v650_v31 = vmul.f32 0.25, %v436_v19  ;;  %v445_v32 = vsel %vm229_vm3, 1.0, %v586_v18  ;;  %v438_v33 = vsel %vm206_vm4, 1.0, %v586_v18  ;;  %s426_s4 = sshll.u32 %s587_s1, 4  ;;  %s427_s4 = int_to_ptr.vmem [resolvable:$true] %s426_s4 }
  0x2f   :  { %v84_v34 = vmul.f32 1.442695, %v72_v26  ;;  %v446_v36 = vsel %vm230_vm5, 1.0, %v586_v18  ;;  %470 = vpow2.f32 %v82_v29  ;;  %vm207_vm6 = vcmp.eq.f32.partialorder %v47_v25, 1.0  ;;  %s556_s5 = scalar_lea.vmem %s427_s4, 1024  ;;  %p561_p3 = scmp.lt.s32.totalorder %s427_s4, %s427_s4 }
  0x30   :  { %v73_v37 = vsub.f32 0.0, %v65_v30  ;;  %v657_v38 = vmul.f32 0.75, %v444_v24  ;;  %v659_v39 = vmul.f32 0.25, %v437_v28  ;;  %v54_v40 = vmax.f32 %v633_v4, 0.0  ;;  %p557_p2 = scmp.ne.s32.totalorder %s427_s4, %s556_s5  ;;  %p562_p4 = scmp.lt.s32.totalorder %s556_s5, %s556_s5 }
  0x31   :  { %472 = vpow2.f32 %v84_v34  ;;  %v662_v43 = vmul.f32 0.75, %v445_v32  ;;  %vm231_vm7 = vcmp.eq.f32.partialorder %v47_v25, 0.0  ;;  %v66_v45 = vand.u32 2147483647, %v654_v35 }
  0x32   :  { %v86_v44 = vmul.f32 1.442695, %v73_v37  ;;  %v665_v48 = vmul.f32 0.25, %v438_v33  ;;  %v667_v49 = vmul.f32 0.75, %v446_v36  ;;  %v439_v50 = vsel %vm207_vm6, 1.0, %v586_v18  ;;  %p563_p5 = por %p562_p4, %p561_p3 }
  0x33   :  { %vm208_vm8 = vcmp.eq.f32.partialorder %v48_v41, 1.0  ;;  %vm232_vm9 = vcmp.eq.f32.partialorder %v48_v41, 0.0  ;;  %v447_v53 = vsel %vm231_vm7, 1.0, %v586_v18  ;;  %v74_v55 = vsub.f32 0.0, %v66_v45 }
  0x34   :  { %474 = vpow2.f32 %v86_v44  ;;  %v55_v57 = vmax.f32 %v636_v11, 0.0  ;;  %v673_v58 = vmul.f32 0.25, %v439_v50  ;;  %v56_v59 = vmax.f32 %v638_v14, 0.0  ;;  %p564_p6 = pnand %p563_p5, %p557_p2 }
  0x35   :  { %v440_v62 = vsel %vm208_vm8, 1.0, %v586_v18  ;;  %v448_v63 = vsel %vm232_vm9, 1.0, %v586_v18  ;;  %v678_v3 = vmul.f32 0.75, %v447_v53  ;;  %vm209_vm10 = vcmp.eq.f32.partialorder %v49_v54, 1.0 }
  0x36   :  { %v465_v42 = vpop.eup %464  ;;  %v88_v5 = vmul.f32 1.442695, %v74_v55  ;;  %vm233_vm11 = vcmp.eq.f32.partialorder %v49_v54, 0.0  ;;  %v680_v10 = vmul.f32 0.25, %v440_v62  ;;  %v682_v12 = vmul.f32 0.75, %v448_v63 }
  0x37   :  { %v467_v46 = vpop.eup %466  ;;  %v92_v47 = vadd.f32 1.0, %v465_v42  ;;  %v95_v52 = vmul.f32 -0.5, %v465_v42  ;;  %v98_v2 = vand.u32 2147483647, %v465_v42  ;;  %v57_v13 = vmax.f32 %v643_v21, 0.0 }
  0x38   :  { %v101_v51 = vadd.f32 1.0, %v467_v46  ;;  %v469_v56 = vpop.eup %468  ;;  %v104_v60 = vmul.f32 -0.5, %v467_v46  ;;  %v107_v7 = vand.u32 2147483647, %v467_v46  ;;  %v688_v20 = vsel %vm209_vm10, 1.0, %v586_v18 }
  0x39   :  { %476 = vlog2.f32 %v92_v47  ;;  %v110_v61 = vadd.f32 1.0, %v469_v56  ;;  %v96_v6 = vadd.f32 1.0, %v95_v52  ;;  %v471_v8 = vpop.eup %470  ;;  %v113_v9 = vmul.f32 -0.5, %v469_v56 }
  0x3a   :  { %478 = vlog2.f32 %v101_v51  ;;  %v105_v17 = vadd.f32 1.0, %v104_v60  ;;  %v119_v19 = vadd.f32 1.0, %v471_v8  ;;  %vm690_vm12 = vcmp.lt.f32.partialorder %v98_v2, 0.0004427343 }
  0x3b   :  { %480 = vlog2.f32 %v110_v61  ;;  %v473_v16 = vpop.eup %472  ;;  %v695_v25 = vsel %vm233_vm11, 1.0, %v586_v18  ;;  %v58_v26 = vmax.f32 %v654_v35, 0.0  ;;  %v97_v28 = vmul.f32 %v465_v42, %v96_v6 }
  0x3c   :  { %482 = vpow2.f32 %v88_v5  ;;  %v128_v24 = vadd.f32 1.0, %v473_v16  ;;  %vm698_vm13 = vcmp.lt.f32.partialorder %v107_v7, 0.0004427343  ;;  %v122_v30 = vmul.f32 -0.5, %v471_v8 }
  0x3d   :  { %v67_v32 = vand.u32 2147483647, %v685_v15  ;;  %v114_v34 = vadd.f32 1.0, %v113_v9  ;;  %v116_v36 = vand.u32 2147483647, %v469_v56  ;;  %484 = vlog2.f32 %v119_v19 }
  0x3e   :  { %v475_v33 = vpop.eup %474  ;;  %v131_v37 = vmul.f32 -0.5, %v473_v16  ;;  %v106_v44 = vmul.f32 %v467_v46, %v105_v17  ;;  %486 = vlog2.f32 %v128_v24  ;;  %v125_v42 = vand.u32 2147483647, %v471_v8 }
  0x3f   :  { %v137_v45 = vadd.f32 1.0, %v475_v33  ;;  %v140_v47 = vmul.f32 -0.5, %v475_v33  ;;  %v134_v52 = vand.u32 2147483647, %v473_v16  ;;  %v123_v54 = vadd.f32 1.0, %v122_v30 }
  0x40   :  { %v75_v55 = vsub.f32 0.0, %v67_v32  ;;  %v115_v61 = vmul.f32 %v469_v56, %v114_v34  ;;  %vm705_vm14 = vcmp.lt.f32.partialorder %v116_v36, 0.0004427343  ;;  %v132_v46 = vadd.f32 1.0, %v131_v37 }
  0x41   :  { %488 = vlog2.f32 %v137_v45  ;;  %v141_v6 = vadd.f32 1.0, %v140_v47  ;;  %v143_v7 = vand.u32 2147483647, %v475_v33  ;;  %vm715_vm15 = vcmp.lt.f32.partialorder %v125_v42, 0.0004427343 }
  0x42   :  { %vm719_vm0 = vcmp.lt.f32.partialorder %v134_v52, 0.0004427343  ;;  %v90_v29 = vmul.f32 1.442695, %v75_v55  ;;  %v133_v34 = vmul.f32 %v473_v16, %v132_v46 }
  0x43   :  { %v477_v41 = vpop.eup %476  ;;  %vm731_vm1 = vcmp.lt.f32.partialorder %v143_v7, 0.0004427343 }
  0x44   :  { %v479_v50 = vpop.eup %478  ;;  %v94_v51 = vmul.f32 0.6931472, %v477_v41  ;;  %v142_v41 = vmul.f32 %v475_v33, %v141_v6 }
  0x45   :  { %v103_v53 = vmul.f32 0.6931472, %v479_v50  ;;  %v481_v63 = vpop.eup %480 }
  0x46   :  { %v100_v60 = vsel %vm690_vm12, %v97_v28, %v94_v51  ;;  %v112_v17 = vmul.f32 0.6931472, %v481_v63  ;;  %v723_v22 = vpop.eup %482  ;;  %v124_v28 = vmul.f32 %v471_v8, %v123_v54 }
  0x47   :  { %v164_v2 = vadd.f32 %v100_v60, %v52_v23  ;;  %v109_v5 = vsel %vm698_vm13, %v106_v44, %v103_v53  ;;  %v146_v8 = vadd.f32 1.0, %v723_v22  ;;  %v152_v47 = vand.u32 2147483647, %v723_v22 }
  0x48   :  { %v165_v9 = vadd.f32 %v109_v5, %v53_v27  ;;  %v118_v27 = vsel %vm705_vm14, %v115_v61, %v112_v17 }
  0x49   :  { %v172_v23 = vsub.f32 %v627_v0, %v164_v2  ;;  %v180_v24 = vsub.f32 0.0, %v164_v2  ;;  %v166_v37 = vadd.f32 %v118_v27, %v54_v40  ;;  %v485_v0 = vpop.eup %484  ;;  %vm776_vm2 = vcmp.lt.f32.partialorder %v152_v47, 0.0004427343 }
  0x4a   :  { %v173_v30 = vsub.f32 %v629_v1, %v165_v9  ;;  %v181_v32 = vsub.f32 0.0, %v165_v9  ;;  %v149_v1 = vmul.f32 -0.5, %v723_v22  ;;  %v487_v50 = vpop.eup %486  ;;  %v121_v61 = vmul.f32 0.6931472, %v485_v0 }
  0x4b   :  { %v188_v36 = vmul.f32 1.442695, %v172_v23  ;;  %v316_v16 = vmul.f32 0.9, %v172_v23  ;;  %v324_v51 = vmul.f32 0.1, %v180_v24  ;;  %v489_v53 = vpop.eup %488  ;;  %v174_v55 = vsub.f32 %v633_v4, %v166_v37 }
  0x4c   :  { %v190_v45 = vmul.f32 1.442695, %v173_v30  ;;  %v364_v42 = vmul.f32 0.1, %v172_v23  ;;  %v372_v52 = vmul.f32 0.9, %v180_v24  ;;  %v127_v6 = vsel %vm715_vm15, %v124_v28, %v121_v61 }
  0x4d   :  { %490 = vpow2.f32 %v188_v36  ;;  %v317_v40 = vmul.f32 0.9, %v173_v30  ;;  %v325_v33 = vmul.f32 0.1, %v181_v32  ;;  %v365_v54 = vmul.f32 0.1, %v173_v30 }
  0x4e   :  { %492 = vpow2.f32 %v190_v45  ;;  %v182_v60 = vsub.f32 0.0, %v166_v37  ;;  %v373_v62 = vmul.f32 0.9, %v181_v32  ;;  %v130_v46 = vmul.f32 0.6931472, %v487_v50 }
  0x4f   :  { %v139_v63 = vmul.f32 0.6931472, %v489_v53  ;;  %494 = vpow2.f32 %v90_v29  ;;  %v739_v2 = vadd.f32 %v324_v51, %v316_v16  ;;  %v192_v5 = vmul.f32 1.442695, %v174_v55 }
  0x50   :  { %496 = vlog2.f32 %v146_v8  ;;  %v743_v7 = vadd.f32 %v372_v52, %v364_v42  ;;  %v318_v9 = vmul.f32 0.9, %v174_v55  ;;  %v167_v17 = vadd.f32 %v127_v6, %v55_v57 }
  0x51   :  { %v136_v4 = vsel %vm719_vm0, %v133_v34, %v130_v46  ;;  %498 = vpow2.f32 %v192_v5  ;;  %v326_v23 = vmul.f32 0.1, %v182_v60  ;;  %v145_v29 = vsel %vm731_vm1, %v142_v41, %v139_v63 }
  0x52   :  { %v168_v24 = vadd.f32 %v136_v4, %v56_v59  ;;  %v333_v56 = vadd.f32 %v325_v33, %v317_v40  ;;  %v381_v28 = vadd.f32 %v373_v62, %v365_v54  ;;  %v175_v30 = vsub.f32 %v636_v11, %v167_v17 }
  0x53   :  { %v183_v32 = vsub.f32 0.0, %v167_v17  ;;  %v366_v27 = vmul.f32 0.1, %v174_v55  ;;  %v374_v36 = vmul.f32 0.9, %v182_v60  ;;  %v150_v37 = vadd.f32 1.0, %v149_v1 }
  0x54   :  { %v176_v57 = vsub.f32 %v638_v14, %v168_v24  ;;  %v194_v19 = vmul.f32 1.442695, %v175_v30  ;;  %v319_v34 = vmul.f32 0.9, %v175_v30  ;;  %v757_v45 = vadd.f32 %v145_v29, %v57_v13 }
  0x55   :  { %v327_v0 = vmul.f32 0.1, %v183_v32  ;;  %v759_v44 = vadd.f32 %v326_v23, %v318_v9  ;;  %v367_v41 = vmul.f32 0.1, %v175_v30  ;;  %v375_v8 = vmul.f32 0.9, %v183_v32 }
  0x56   :  { %v196_v50 = vmul.f32 1.442695, %v176_v57  ;;  %500 = vpow2.f32 %v194_v19  ;;  %v184_v42 = vsub.f32 0.0, %v168_v24  ;;  %v382_v52 = vadd.f32 %v374_v36, %v366_v27 }
  0x57   :  { %v491_v59 = vpop.eup %490  ;;  %v177_v53 = vsub.f32 %v643_v21, %v757_v45  ;;  %v766_v54 = vmul.f32 %v723_v22, %v150_v37  ;;  %v768_v62 = vadd.f32 %v327_v0, %v319_v34  ;;  %v770_v46 = vadd.f32 %v375_v8, %v367_v41 }
  0x58   :  { %v493_v11 = vpop.eup %492  ;;  %v252_v16 = vsub.f32 0.9, %v491_v59  ;;  %v452_v51 = vadd.f32 -0.1, %v491_v59  ;;  %502 = vpow2.f32 %v196_v50  ;;  %v320_v6 = vmul.f32 0.9, %v176_v57 }
  0x59   :  { %v253_v14 = vsub.f32 0.9, %v493_v11  ;;  %v453_v1 = vadd.f32 -0.1, %v493_v11  ;;  %v761_v40 = vpop.eup %494  ;;  %v328_v9 = vmul.f32 0.1, %v184_v42 }
  0x5a   :  { %v260_v33 = vand.u32 2147483647, %v252_v16  ;;  %v276_v13 = vand.u32 2147483647, %v452_v51  ;;  %v497_v55 = vpop.eup %496  ;;  %v368_v24 = vmul.f32 0.1, %v176_v57 }
  0x5b   :  { %v261_v60 = vand.u32 2147483647, %v253_v14  ;;  %v277_v61 = vand.u32 2147483647, %v453_v1  ;;  %v499_v17 = vpop.eup %498  ;;  %v376_v29 = vmul.f32 0.9, %v184_v42  ;;  %v336_v22 = vadd.f32 %v328_v9, %v320_v6 }
  0x5c   :  { %v284_v63 = vmul.f32 %v260_v33, %v260_v33  ;;  %v292_v5 = vmul.f32 %v276_v13, %v276_v13  ;;  %v254_v32 = vsub.f32 0.9, %v499_v17  ;;  %v454_v27 = vadd.f32 -0.1, %v499_v17 }
  0x5d   :  { %v285_v4 = vmul.f32 %v261_v60, %v261_v60  ;;  %v293_v23 = vmul.f32 %v277_v61, %v277_v61  ;;  %v185_v34 = vsub.f32 0.0, %v757_v45  ;;  %v198_v57 = vmul.f32 1.442695, %v177_v53 }
  0x5e   :  { %v308_v21 = vmul.f32 %v650_v31, %v284_v63  ;;  %v356_v30 = vmul.f32 %v657_v38, %v292_v5  ;;  %v262_v38 = vand.u32 2147483647, %v254_v32  ;;  %v278_v59 = vand.u32 2147483647, %v454_v27 }
  0x5f   :  { %v309_v37 = vmul.f32 %v659_v39, %v285_v4  ;;  %v357_v19 = vmul.f32 %v662_v43, %v293_v23  ;;  %504 = vpow2.f32 %v198_v57  ;;  %v321_v39 = vmul.f32 0.9, %v177_v53 }
  0x60   :  { %v340_v0 = vmul.f32 %v739_v2, %v308_v21  ;;  %v388_v31 = vmul.f32 %v743_v7, %v356_v30  ;;  %v501_v47 = vpop.eup %500  ;;  %v286_v11 = vmul.f32 %v262_v38, %v262_v38  ;;  %v294_v16 = vmul.f32 %v278_v59, %v278_v59 }
  0x61   :  { %v341_v41 = vmul.f32 %v333_v56, %v309_v37  ;;  %v389_v8 = vmul.f32 %v381_v28, %v357_v19  ;;  %v255_v42 = vsub.f32 0.9, %v501_v47  ;;  %v455_v45 = vadd.f32 -0.1, %v501_v47 }
  0x62   :  { %v396_v50 = vadd.f32 %v388_v31, %v340_v0  ;;  %v503_v51 = vpop.eup %502  ;;  %v329_v14 = vmul.f32 0.1, %v185_v34  ;;  %v310_v2 = vmul.f32 %v665_v48, %v286_v11  ;;  %v358_v7 = vmul.f32 %v667_v49, %v294_v16 }
  0x63   :  { %v397_v43 = vadd.f32 %v389_v8, %v341_v41  ;;  %v256_v33 = vsub.f32 0.9, %v503_v51  ;;  %v263_v28 = vand.u32 2147483647, %v255_v42  ;;  %v279_v13 = vand.u32 2147483647, %v455_v45 }
  0x64   :  { %v404_v1 = vsub.f32 0.0, %v396_v50  ;;  %v384_v60 = vadd.f32 %v376_v29, %v368_v24  ;;  %v342_v61 = vmul.f32 %v759_v44, %v310_v2  ;;  %v390_v63 = vmul.f32 %v382_v52, %v358_v7  ;;  %v50_v45 = vld [vmem:[#allocation5 + $0x30] sm:$0xff] }
  0x65   :  { %v405_v56 = vsub.f32 0.0, %v397_v43  ;;  %v264_v5 = vand.u32 2147483647, %v256_v33  ;;  %v456_v6 = vadd.f32 -0.1, %v503_v51  ;;  %v287_v9 = vmul.f32 %v263_v28, %v263_v28 }
  0x66   :  { %412 = vst [vmem:[#allocation7] sm:$0xff] %v404_v1  ;;  %v295_v17 = vmul.f32 %v279_v13, %v279_v13  ;;  %v369_v4 = vmul.f32 0.1, %v177_v53  ;;  %v148_v23 = vmul.f32 0.6931472, %v497_v55  ;;  %v398_v21 = vadd.f32 %v390_v63, %v342_v61 }
  0x67   :  { %413 = vst [vmem:[#allocation7 + $0x8] sm:$0xff] %v405_v56  ;;  %v280_v48 = vand.u32 2147483647, %v456_v6  ;;  %v288_v30 = vmul.f32 %v264_v5, %v264_v5  ;;  %v155_v49 = vadd.f32 1.0, %v761_v40  ;;  %v311_v32 = vmul.f32 %v673_v58, %v287_v9 }
  0x68   :  { %v359_v24 = vmul.f32 %v678_v3, %v295_v17  ;;  %v377_v29 = vmul.f32 0.9, %v185_v34  ;;  %v154_v44 = vsel %vm776_vm2, %v766_v54, %v148_v23  ;;  %v406_v52 = vsub.f32 0.0, %v398_v21 }
  0x69   :  { %v296_v27 = vmul.f32 %v280_v48, %v280_v48  ;;  %v312_v37 = vmul.f32 %v680_v10, %v288_v30  ;;  %v170_v53 = vadd.f32 %v154_v44, %v58_v26  ;;  %v505_v55 = vpop.eup %504  ;;  %v343_v19 = vmul.f32 %v768_v62, %v311_v32 }
  0x6a   :  { %v391_v57 = vmul.f32 %v770_v46, %v359_v24  ;;  %506 = vlog2.f32 %v155_v49  ;;  %v158_v58 = vmul.f32 -0.5, %v761_v40  ;;  %414 = vst [vmem:[#allocation7 + $0x10] sm:$0xff] %v406_v52  ;;  %v257_v54 = vsub.f32 0.9, %v505_v55 }
  0x6b   :  { %v344_v3 = vmul.f32 %v336_v22, %v312_v37  ;;  %v360_v36 = vmul.f32 %v682_v12, %v296_v27  ;;  %v457_v34 = vadd.f32 -0.1, %v505_v55  ;;  %v305_v10 = vmul.f32 0.25, %v688_v20  ;;  %v51_v37 = vld [vmem:[#allocation5 + $0x38] sm:$0xff] }
  0x6c   :  { %v399_v0 = vadd.f32 %v391_v57, %v343_v19  ;;  %v178_v31 = vsub.f32 %v654_v35, %v170_v53  ;;  %v265_v38 = vand.u32 2147483647, %v257_v54  ;;  %v353_v62 = vmul.f32 0.75, %v695_v25 }
  0x6d   :  { %v392_v26 = vmul.f32 %v384_v60, %v360_v36  ;;  %v281_v59 = vand.u32 2147483647, %v457_v34  ;;  %v337_v41 = vadd.f32 %v329_v14, %v321_v39  ;;  %v385_v8 = vadd.f32 %v377_v29, %v369_v4 }
  0x6e   :  { %v407_v46 = vsub.f32 0.0, %v399_v0  ;;  %v200_v47 = vmul.f32 1.442695, %v178_v31  ;;  %v289_v22 = vmul.f32 %v265_v38, %v265_v38  ;;  %v159_v12 = vadd.f32 1.0, %v158_v58 }
  0x6f   :  { %v400_v50 = vadd.f32 %v392_v26, %v344_v3  ;;  %v297_v11 = vmul.f32 %v281_v59, %v281_v59  ;;  %v161_v16 = vand.u32 2147483647, %v761_v40  ;;  %v59_v14 = vmax.f32 %v685_v15, 0.0 }
  0x70   :  { %415 = vst [vmem:[#allocation7 + $0x18] sm:$0xff] %v407_v46  ;;  %508 = vpow2.f32 %v200_v47  ;;  %v313_v51 = vmul.f32 %v305_v10, %v289_v22  ;;  %v160_v25 = vmul.f32 %v761_v40, %v159_v12  ;;  %v186_v7 = vsub.f32 0.0, %v170_v53 }
  0x71   :  { %v408_v20 = vsub.f32 0.0, %v400_v50  ;;  %v361_v35 = vmul.f32 %v353_v62, %v297_v11  ;;  %vm162_vm3 = vcmp.lt.f32.partialorder %v161_v16, 0.0004427343  ;;  %vm210_vm4 = vcmp.eq.f32.partialorder %v50_v45, 1.0 }
  0x72   :  { %v345_v43 = vmul.f32 %v337_v41, %v313_v51  ;;  %vm234_vm5 = vcmp.eq.f32.partialorder %v50_v45, 0.0  ;;  %v442_v13 = vsel %vm210_vm4, 1.0, %v586_v18  ;;  %v322_v63 = vmul.f32 0.9, %v178_v31 }
  0x73   :  { %416 = vst [vmem:[#allocation7 + $0x20] sm:$0xff] %v408_v20  ;;  %v393_v42 = vmul.f32 %v385_v8, %v361_v35  ;;  %v450_v60 = vsel %vm234_vm5, 1.0, %v586_v18  ;;  %v330_v40 = vmul.f32 0.1, %v186_v7  ;;  %v370_v5 = vmul.f32 0.1, %v178_v31 }
  0x74   :  { %v507_v39 = vpop.eup %506  ;;  %v378_v4 = vmul.f32 0.9, %v186_v7  ;;  %v306_v30 = vmul.f32 0.25, %v442_v13  ;;  %v354_v49 = vmul.f32 0.75, %v450_v60  ;;  %vm211_vm6 = vcmp.eq.f32.partialorder %v51_v37, 1.0 }
  0x75   :  { %v401_v1 = vadd.f32 %v393_v42, %v345_v43  ;;  %v157_v2 = vmul.f32 0.6931472, %v507_v39  ;;  %v338_v29 = vadd.f32 %v330_v40, %v322_v63  ;;  %vm235_vm7 = vcmp.eq.f32.partialorder %v51_v37, 0.0 }
  0x76   :  { %v386_v44 = vadd.f32 %v378_v4, %v370_v5  ;;  %v443_v58 = vsel %vm211_vm6, 1.0, %v586_v18  ;;  %v451_v3 = vsel %vm235_vm7, 1.0, %v586_v18 }
  0x77   :  { %v409_v33 = vsub.f32 0.0, %v401_v1  ;;  %v163_v56 = vsel %vm162_vm3, %v160_v25, %v157_v2  ;;  %v307_v62 = vmul.f32 0.25, %v443_v58  ;;  %v355_v46 = vmul.f32 0.75, %v451_v3 }
  0x78   :  { %v171_v28 = vadd.f32 %v163_v56, %v59_v14 }
  0x79   :  { %417 = vst [vmem:[#allocation7 + $0x28] sm:$0xff] %v409_v33 }
  0x7a   :  { %v509_v61 = vpop.eup %508  ;;  %v179_v6 = vsub.f32 %v685_v15, %v171_v28  ;;  %v187_v19 = vsub.f32 0.0, %v171_v28 }
  0x7b   :  { %v258_v9 = vsub.f32 0.9, %v509_v61  ;;  %v458_v17 = vadd.f32 -0.1, %v509_v61 }
  0x7c   :  { %v202_v23 = vmul.f32 1.442695, %v179_v6  ;;  %v323_v54 = vmul.f32 0.9, %v179_v6  ;;  %v331_v34 = vmul.f32 0.1, %v187_v19 }
  0x7d   :  { %v266_v21 = vand.u32 2147483647, %v258_v9  ;;  %v282_v48 = vand.u32 2147483647, %v458_v17  ;;  %v371_v0 = vmul.f32 0.1, %v179_v6 }
  0x7e   :  { %510 = vpow2.f32 %v202_v23  ;;  %v379_v26 = vmul.f32 0.9, %v187_v19  ;;  %v339_v47 = vadd.f32 %v331_v34, %v323_v54 }
  0x7f   :  { %v290_v32 = vmul.f32 %v266_v21, %v266_v21  ;;  %v298_v24 = vmul.f32 %v282_v48, %v282_v48 }
  0x80   :  { %v387_v50 = vadd.f32 %v379_v26, %v371_v0 }
  0x81   :  { %v314_v52 = vmul.f32 %v306_v30, %v290_v32  ;;  %v362_v27 = vmul.f32 %v354_v49, %v298_v24 }
  0x83   :  { %v346_v53 = vmul.f32 %v338_v29, %v314_v52  ;;  %v394_v55 = vmul.f32 %v386_v44, %v362_v27 }
  0x85   :  { %v402_v15 = vadd.f32 %v394_v55, %v346_v53 }
  0x87   :  { %v410_v57 = vsub.f32 0.0, %v402_v15 }
  0x88   :  { %v511_v36 = vpop.eup %510 }
  0x89   :  { %418 = vst [vmem:[#allocation7 + $0x30] sm:$0xff] %v410_v57  ;;  %v259_v10 = vsub.f32 0.9, %v511_v36  ;;  %v459_v31 = vadd.f32 -0.1, %v511_v36 }
  0x8b   :  { %v267_v38 = vand.u32 2147483647, %v259_v10  ;;  %v283_v59 = vand.u32 2147483647, %v459_v31 }
  0x8d   :  { %v291_v41 = vmul.f32 %v267_v38, %v267_v38  ;;  %v299_v8 = vmul.f32 %v283_v59, %v283_v59 }
  0x8f   :  { %v315_v22 = vmul.f32 %v307_v62, %v291_v41  ;;  %v363_v11 = vmul.f32 %v355_v46, %v299_v8 }
  0x91   :  { %v347_v12 = vmul.f32 %v339_v47, %v315_v22  ;;  %v395_v18 = vmul.f32 %v387_v50, %v363_v11 }
  0x93   :  { %v403_v16 = vadd.f32 %v395_v18, %v347_v12 }
  0x95   :  { %v411_v20 = vsub.f32 0.0, %v403_v16 }
  0x97   :  { %419 = vst [vmem:[#allocation7 + $0x38] sm:$0xff] %v411_v20 }
  0x98   :  { %567 = shalt.err (!%p564_p6)
}
  0x99   :  { %s568_s8 = scalar_lea.hbm %s826_s2, 1024 }
  0x9a   :  { %p569_p7 = scmp.ne.s32.totalorder %s826_s2, %s568_s8  ;;  %p572_p8 = scmp.lt.u32.totalorder %s568_s8, %s826_s2 }
  0x9c   :  { %p574_p9 = pnand %p572_p8, %p569_p7 }
  0x9e   :  { %577 = shalt.err (!%p574_p9)
}
  0x9f   :  { %429 = dma.vmem_to_hbm [thread:$0]  %s427_s4, 1024, %s826_s2, [#allocation4]  }
  0xa0   :  { %582 = dma.done.wait [#allocation4], 1024  }
  0xa1   :  { %583 = vsyncadd [#allocation4], 4294966272 }
  0xa2   :  { %433 = vsyncpa [#allocation3], 1 }
  0xa3   :  { %434 = vsyncpa [#allocation6], 1 }
  0xa4   :  { %435 = vsyncpa [#allocation4], 1 }

</bundles_post_ra>
